<compile_context>
chip_gen: v6e
topology: v6e:2x2x1
jax: 0.10.0
libtpu: 0.0.40
codegen_flags: <defaults>
</compile_context>

<pallas_src>
import jax
import jax.numpy as jnp
from jax import lax
from jax.experimental import pallas as pl
from jax.experimental.pallas import tpu as pltpu


# -----------------------------------------------------------------------------
# Pallas kernel: fused bidirectional LSTM recurrence + final FC, one grid point.
# All operands are tiny and live fully in VMEM.
# -----------------------------------------------------------------------------
def _bilstm_fc_kernel(xp_ref,    # [S, Bp, 8H]  precomputed x@W_ih + b, fused gate layout
                      mask_ref,  # [S, Bp, 2H]  f32 validity mask (fwd half | bwd half)
                      whh_ref,   # [2H, 8H]     block-diagonal recurrent weights
                      fcw_ref,   # [H, O]       fc weight (pre-transposed)
                      fcb_ref,   # [1, O]       fc bias
                      out_ref):  # [Bp, O]
    S, Bp, G = xp_ref.shape      # G = 8H
    H2 = G // 4                  # 2H (width of one fused gate block)
    H = H2 // 2

    # Hoist all weight reads out of the recurrence (loaded once).
    whh = whh_ref[...]           # [2H, 8H]
    fcw = fcw_ref[...]           # [H, O]
    fcb = fcb_ref[...]           # [1, O]

    h = jnp.zeros((Bp, H2), jnp.float32)   # [h_fwd | h_bwd]
    c = jnp.zeros((Bp, H2), jnp.float32)

    # Fully-unrolled fused recurrence: one MXU matmul per step.
    # Fused gate column layout: [ i(2H) | f(2H) | o(2H) | g(2H) ],
    # each 2H block itself laid out as [fwd_H | bwd_H] to match h.
    for t in range(S):
        gates = jnp.dot(h, whh, preferred_element_type=jnp.float32) + xp_ref[t]
        ifo = jax.nn.sigmoid(gates[:, 0:3 * H2])        # i, f, o (contiguous)
        g_g = jnp.tanh(gates[:, 3 * H2:])               # g
        i_g = ifo[:, 0:H2]
        f_g = ifo[:, H2:2 * H2]
        o_g = ifo[:, 2 * H2:]

        c_new = f_g * c + i_g * g_g
        h_new = o_g * jnp.tanh(c_new)

        m = mask_ref[t] != 0.0                          # [Bp, 2H] bool
        c = jnp.where(m, c_new, c)
        h = jnp.where(m, h_new, h)

    # fc(h_fwd + h_bwd)
    h_sum = h[:, 0:H] + h[:, H:]
    out_ref[...] = jnp.dot(h_sum, fcw, preferred_element_type=jnp.float32) + fcb


# -----------------------------------------------------------------------------
# Wrapper: embedding gather, input-projection hoist, weight fusion, batch pad.
# -----------------------------------------------------------------------------
def lstm_model_forward(names, name_lens, params):
    """names: [S, B] int32, name_lens: [B] int32 (lengths <= S)."""
    S, B = names.shape
    H = params["whh_f"].shape[1]            # whh_* is [4H, H]
    O = params["fc_w"].shape[0]
    Bp = max(8, ((B + 7) // 8) * 8)         # pad batch to full sublanes

    hp = "highest"                          # keep wrapper math in full f32

    # Embedding lookup (gather) stays in plain JAX glue.
    x = params["emb"][names].astype(jnp.float32)        # [S, B, E]

    def split4(a):
        return jnp.split(a, 4, axis=-1)     # PyTorch gate order i, f, g, o

    # --- Hoisted input projections (bias folded), both directions at once. ---
    b_f = (params["bih_f"] + params["bhh_f"])[None, None, :]     # [1, 1, 4H]
    b_b = (params["bih_b"] + params["bhh_b"])[None, None, :]
    xp_f = jnp.einsum("sbe,ge->sbg", x, params["wih_f"], precision=hp) + b_f
    xp_b = jnp.einsum("sbe,ge->sbg", x[::-1], params["wih_b"], precision=hp) + b_b
    i_f, f_f, g_f, o_f = split4(xp_f)       # each [S, B, H]
    i_b, f_b, g_b, o_b = split4(xp_b)
    # Fused gate layout: [ i_f | i_b | f_f | f_b | o_f | o_b | g_f | g_b ]
    xp = jnp.concatenate([i_f, i_b, f_f, f_b, o_f, o_b, g_f, g_b], axis=-1)
    xp = jnp.pad(xp, ((0, 0), (0, Bp - B), (0, 0)))              # [S, Bp, 8H]

    # --- Block-diagonal recurrent weight in the same fused layout. [2H, 8H] ---
    wf_i, wf_f, wf_g, wf_o = split4(params["whh_f"].T)           # each [H, H]
    wb_i, wb_f, wb_g, wb_o = split4(params["whh_b"].T)
    Z = jnp.zeros((H, H), jnp.float32)
    whh_blk = jnp.concatenate(
        [jnp.concatenate([wf_i, Z, wf_f, Z, wf_o, Z, wf_g, Z], axis=-1),
         jnp.concatenate([Z, wb_i, Z, wb_f, Z, wb_o, Z, wb_g], axis=-1)],
        axis=0)

    # --- Per-step validity masks (packed-sequence semantics), precomputed. ---
    t_idx = jnp.arange(S)[:, None, None]                         # [S, 1, 1]
    lens = name_lens.astype(jnp.int32)[None, :, None]            # [1, B, 1]
    fwd_valid = t_idx < lens                                     # step t uses x[t]
    bwd_valid = (S - 1 - t_idx) < lens                           # step t uses x[S-1-t]
    valid = jnp.concatenate(
        [jnp.broadcast_to(fwd_valid, (S, B, H)),
         jnp.broadcast_to(bwd_valid, (S, B, H))], axis=-1)
    valid = jnp.pad(valid, ((0, 0), (0, Bp - B), (0, 0)))        # padded rows -> False
    valid = valid.astype(jnp.float32)                            # [S, Bp, 2H]

    vmem = lambda: pl.BlockSpec(memory_space=pltpu.MemorySpace.VMEM)
    out = pl.pallas_call(
        _bilstm_fc_kernel,
        out_shape=jax.ShapeDtypeStruct((Bp, O), jnp.float32),
        in_specs=[vmem() for _ in range(5)],
        out_specs=vmem(),
    )(xp, valid, whh_blk, params["fc_w"].T, params["fc_b"].reshape(1, O))
    return out[:B]


# -----------------------------------------------------------------------------
# Pure-JAX reference (same math) for a correctness check.
# -----------------------------------------------------------------------------
def ref_forward(names, name_lens, params):
    x = params["emb"][names]                 # [S, B, E]
    S, B, E = x.shape
    H = params["whh_f"].shape[1]             # whh_* is [4H, H]
    lens = name_lens.astype(jnp.int32)
    hp = "highest"

    def run_dir(wih, whh, b, reverse):
        def cell(carry, inputs):
            h, c = carry
            x_t, t = inputs
            gates = (jnp.dot(x_t, wih.T, precision=hp)
                     + jnp.dot(h, whh.T, precision=hp) + b)
            i_g = jax.nn.sigmoid(gates[:, 0:H])
            f_g = jax.nn.sigmoid(gates[:, H:2 * H])
            g_g = jnp.tanh(gates[:, 2 * H:3 * H])
            o_g = jax.nn.sigmoid(gates[:, 3 * H:4 * H])
            c_new = f_g * c + i_g * g_g
            h_new = o_g * jnp.tanh(c_new)
            m = (t < lens)[:, None]
            return (jnp.where(m, h_new, h), jnp.where(m, c_new, c)), None

        ts = jnp.arange(S)
        xs = (x, ts)
        if reverse:
            xs = (x[::-1], ts[::-1])
        (h, _), _ = lax.scan(cell, (jnp.zeros((B, H)), jnp.zeros((B, H))), xs)
        return h

    h_f = run_dir(params["wih_f"], params["whh_f"],
                  params["bih_f"] + params["bhh_f"], False)
    h_b = run_dir(params["wih_b"], params["whh_b"],
                  params["bih_b"] + params["bhh_b"], True)
    return jnp.dot(h_f + h_b, params["fc_w"].T, precision=hp) + params["fc_b"]


# -----------------------------------------------------------------------------
# Deterministic param init + demo
# -----------------------------------------------------------------------------
def init_params(key, vocab_size, char_vec_dim, hidden_dim, output_dim):
    ks = jax.random.split(key, 11)
    s = 0.1
    H, E, O = hidden_dim, char_vec_dim, output_dim
    return {
        "emb":   s * jax.random.normal(ks[0], (vocab_size, E), jnp.float32),
        "wih_f": s * jax.random.normal(ks[1], (4 * H, E), jnp.float32),
        "whh_f": s * jax.random.normal(ks[2], (4 * H, H), jnp.float32),
        "bih_f": s * jax.random.normal(ks[3], (4 * H,), jnp.float32),
        "bhh_f": s * jax.random.normal(ks[4], (4 * H,), jnp.float32),
        "wih_b": s * jax.random.normal(ks[5], (4 * H, E), jnp.float32),
        "whh_b": s * jax.random.normal(ks[6], (4 * H, H), jnp.float32),
        "bih_b": s * jax.random.normal(ks[7], (4 * H,), jnp.float32),
        "bhh_b": s * jax.random.normal(ks[8], (4 * H,), jnp.float32),
        "fc_w":  s * jax.random.normal(ks[9], (O, H), jnp.float32),
        "fc_b":  s * jax.random.normal(ks[10], (O,), jnp.float32),
    }


if __name__ == "__main__":
    vocab_size, char_vec_dim, hidden_dim, output_dim = 30, 16, 32, 8
    S, B = 8, 2

    key = jax.random.PRNGKey(0)
    pkey, nkey = jax.random.split(key)
    params = init_params(pkey, vocab_size, char_vec_dim, hidden_dim, output_dim)

    # names: [S, B] int32; lengths <= S (sorted descending like PyTorch's
    # pack_padded_sequence, though the masked kernel doesn't require sorting).
    names = jax.random.randint(nkey, (S, B), 0, vocab_size, dtype=jnp.int32)
    name_lens = jnp.array([8, 5], dtype=jnp.int32)

    out = lstm_model_forward(names, name_lens, params)
    out = jax.block_until_ready(out)

    ref = ref_forward(names, name_lens, params)
    assert out.shape == (B, output_dim)
    assert jnp.allclose(out, ref, atol=1e-4, rtol=1e-4), (
        f"max abs err = {jnp.max(jnp.abs(out - ref))}")

    print("KERNEL_OK")
</pallas_src>

<mosaic_0001>
module attributes {stable_mosaic.version = 11 : i64} {
  func.func @_bilstm_fc_kernel(%arg0: memref<8x8x256xf32, #tpu.memory_space<vmem>>, %arg1: memref<8x8x64xf32, #tpu.memory_space<vmem>>, %arg2: memref<64x256xf32, #tpu.memory_space<vmem>>, %arg3: memref<32x8xf32, #tpu.memory_space<vmem>>, %arg4: memref<1x8xf32, #tpu.memory_space<vmem>>, %arg5: memref<8x8xf32, #tpu.memory_space<vmem>>) attributes {dimension_semantics = [], scalar_prefetch = 0 : i64, scratch_operands = 0 : i64, tpu.core_type = #tpu.core_type<tc>} {
    %c0 = arith.constant 0 : index
    %c0_0 = arith.constant 0 : index
    %0 = vector.load %arg2[%c0, %c0_0] : memref<64x256xf32, #tpu.memory_space<vmem>>, vector<64x256xf32>
    %c0_1 = arith.constant 0 : index
    %c0_2 = arith.constant 0 : index
    %1 = vector.load %arg3[%c0_1, %c0_2] : memref<32x8xf32, #tpu.memory_space<vmem>>, vector<32x8xf32>
    %c0_3 = arith.constant 0 : index
    %c0_4 = arith.constant 0 : index
    %2 = vector.load %arg4[%c0_3, %c0_4] : memref<1x8xf32, #tpu.memory_space<vmem>>, vector<1x8xf32>
    %cst = arith.constant 0.000000e+00 : f32
    %3 = vector.broadcast %cst : f32 to vector<8x64xf32>
    %cst_5 = arith.constant 0.000000e+00 : f32
    %4 = vector.broadcast %cst_5 : f32 to vector<8x64xf32>
    %cst_6 = arith.constant dense<0.000000e+00> : vector<8x256xf32>
    %5 = tpu.matmul %3, %0, %cst_6 {dimension_numbers = #tpu.dot_dimension_numbers<[1], [0], [0], [1], [0, 0, 1, 1], [], []>} : vector<8x64xf32>, vector<64x256xf32>, vector<8x256xf32> -> vector<8x256xf32>
    %c0_7 = arith.constant 0 : index
    %c0_8 = arith.constant 0 : index
    %c0_9 = arith.constant 0 : index
    %6 = vector.load %arg0[%c0_7, %c0_8, %c0_9] : memref<8x8x256xf32, #tpu.memory_space<vmem>>, vector<1x8x256xf32>
    %7 = vector.shape_cast %6 : vector<1x8x256xf32> to vector<8x256xf32>
    %8 = arith.addf %5, %7 : vector<8x256xf32>
    %9 = vector.extract_strided_slice %8 {offsets = [0, 0], sizes = [8, 192], strides = [1, 1]} : vector<8x256xf32> to vector<8x192xf32>
    %10 = arith.negf %9 : vector<8x192xf32>
    %11 = math.exp %10 : vector<8x192xf32>
    %cst_10 = arith.constant 1.000000e+00 : f32
    %12 = vector.broadcast %cst_10 : f32 to vector<8x192xf32>
    %13 = arith.addf %12, %11 : vector<8x192xf32>
    %14 = arith.divf %12, %13 : vector<8x192xf32>
    %15 = vector.extract_strided_slice %8 {offsets = [0, 192], sizes = [8, 64], strides = [1, 1]} : vector<8x256xf32> to vector<8x64xf32>
    %16 = math.tanh %15 : vector<8x64xf32>
    %17 = vector.extract_strided_slice %14 {offsets = [0, 0], sizes = [8, 64], strides = [1, 1]} : vector<8x192xf32> to vector<8x64xf32>
    %18 = vector.extract_strided_slice %14 {offsets = [0, 64], sizes = [8, 64], strides = [1, 1]} : vector<8x192xf32> to vector<8x64xf32>
    %19 = vector.extract_strided_slice %14 {offsets = [0, 128], sizes = [8, 64], strides = [1, 1]} : vector<8x192xf32> to vector<8x64xf32>
    %20 = arith.mulf %18, %4 : vector<8x64xf32>
    %21 = arith.mulf %17, %16 : vector<8x64xf32>
    %22 = arith.addf %20, %21 : vector<8x64xf32>
    %23 = math.tanh %22 : vector<8x64xf32>
    %24 = arith.mulf %19, %23 : vector<8x64xf32>
    %c0_11 = arith.constant 0 : index
    %c0_12 = arith.constant 0 : index
    %c0_13 = arith.constant 0 : index
    %25 = vector.load %arg1[%c0_11, %c0_12, %c0_13] : memref<8x8x64xf32, #tpu.memory_space<vmem>>, vector<1x8x64xf32>
    %26 = vector.shape_cast %25 : vector<1x8x64xf32> to vector<8x64xf32>
    %cst_14 = arith.constant 0.000000e+00 : f32
    %27 = vector.broadcast %cst_14 : f32 to vector<8x64xf32>
    %28 = arith.cmpf one, %26, %27 : vector<8x64xf32>
    %29 = arith.select %28, %22, %4 : vector<8x64xi1>, vector<8x64xf32>
    %30 = arith.select %28, %24, %3 : vector<8x64xi1>, vector<8x64xf32>
    %cst_15 = arith.constant dense<0.000000e+00> : vector<8x256xf32>
    %31 = tpu.matmul %30, %0, %cst_15 {dimension_numbers = #tpu.dot_dimension_numbers<[1], [0], [0], [1], [0, 0, 1, 1], [], []>} : vector<8x64xf32>, vector<64x256xf32>, vector<8x256xf32> -> vector<8x256xf32>
    %c1 = arith.constant 1 : index
    %c0_16 = arith.constant 0 : index
    %c0_17 = arith.constant 0 : index
    %32 = vector.load %arg0[%c1, %c0_16, %c0_17] : memref<8x8x256xf32, #tpu.memory_space<vmem>>, vector<1x8x256xf32>
    %33 = vector.shape_cast %32 : vector<1x8x256xf32> to vector<8x256xf32>
    %34 = arith.addf %31, %33 : vector<8x256xf32>
    %35 = vector.extract_strided_slice %34 {offsets = [0, 0], sizes = [8, 192], strides = [1, 1]} : vector<8x256xf32> to vector<8x192xf32>
    %36 = arith.negf %35 : vector<8x192xf32>
    %37 = math.exp %36 : vector<8x192xf32>
    %cst_18 = arith.constant 1.000000e+00 : f32
    %38 = vector.broadcast %cst_18 : f32 to vector<8x192xf32>
    %39 = arith.addf %38, %37 : vector<8x192xf32>
    %40 = arith.divf %38, %39 : vector<8x192xf32>
    %41 = vector.extract_strided_slice %34 {offsets = [0, 192], sizes = [8, 64], strides = [1, 1]} : vector<8x256xf32> to vector<8x64xf32>
    %42 = math.tanh %41 : vector<8x64xf32>
    %43 = vector.extract_strided_slice %40 {offsets = [0, 0], sizes = [8, 64], strides = [1, 1]} : vector<8x192xf32> to vector<8x64xf32>
    %44 = vector.extract_strided_slice %40 {offsets = [0, 64], sizes = [8, 64], strides = [1, 1]} : vector<8x192xf32> to vector<8x64xf32>
    %45 = vector.extract_strided_slice %40 {offsets = [0, 128], sizes = [8, 64], strides = [1, 1]} : vector<8x192xf32> to vector<8x64xf32>
    %46 = arith.mulf %44, %29 : vector<8x64xf32>
    %47 = arith.mulf %43, %42 : vector<8x64xf32>
    %48 = arith.addf %46, %47 : vector<8x64xf32>
    %49 = math.tanh %48 : vector<8x64xf32>
    %50 = arith.mulf %45, %49 : vector<8x64xf32>
    %c1_19 = arith.constant 1 : index
    %c0_20 = arith.constant 0 : index
    %c0_21 = arith.constant 0 : index
    %51 = vector.load %arg1[%c1_19, %c0_20, %c0_21] : memref<8x8x64xf32, #tpu.memory_space<vmem>>, vector<1x8x64xf32>
    %52 = vector.shape_cast %51 : vector<1x8x64xf32> to vector<8x64xf32>
    %cst_22 = arith.constant 0.000000e+00 : f32
    %53 = vector.broadcast %cst_22 : f32 to vector<8x64xf32>
    %54 = arith.cmpf one, %52, %53 : vector<8x64xf32>
    %55 = arith.select %54, %48, %29 : vector<8x64xi1>, vector<8x64xf32>
    %56 = arith.select %54, %50, %30 : vector<8x64xi1>, vector<8x64xf32>
    %cst_23 = arith.constant dense<0.000000e+00> : vector<8x256xf32>
    %57 = tpu.matmul %56, %0, %cst_23 {dimension_numbers = #tpu.dot_dimension_numbers<[1], [0], [0], [1], [0, 0, 1, 1], [], []>} : vector<8x64xf32>, vector<64x256xf32>, vector<8x256xf32> -> vector<8x256xf32>
    %c2 = arith.constant 2 : index
    %c0_24 = arith.constant 0 : index
    %c0_25 = arith.constant 0 : index
    %58 = vector.load %arg0[%c2, %c0_24, %c0_25] : memref<8x8x256xf32, #tpu.memory_space<vmem>>, vector<1x8x256xf32>
    %59 = vector.shape_cast %58 : vector<1x8x256xf32> to vector<8x256xf32>
    %60 = arith.addf %57, %59 : vector<8x256xf32>
    %61 = vector.extract_strided_slice %60 {offsets = [0, 0], sizes = [8, 192], strides = [1, 1]} : vector<8x256xf32> to vector<8x192xf32>
    %62 = arith.negf %61 : vector<8x192xf32>
    %63 = math.exp %62 : vector<8x192xf32>
    %cst_26 = arith.constant 1.000000e+00 : f32
    %64 = vector.broadcast %cst_26 : f32 to vector<8x192xf32>
    %65 = arith.addf %64, %63 : vector<8x192xf32>
    %66 = arith.divf %64, %65 : vector<8x192xf32>
    %67 = vector.extract_strided_slice %60 {offsets = [0, 192], sizes = [8, 64], strides = [1, 1]} : vector<8x256xf32> to vector<8x64xf32>
    %68 = math.tanh %67 : vector<8x64xf32>
    %69 = vector.extract_strided_slice %66 {offsets = [0, 0], sizes = [8, 64], strides = [1, 1]} : vector<8x192xf32> to vector<8x64xf32>
    %70 = vector.extract_strided_slice %66 {offsets = [0, 64], sizes = [8, 64], strides = [1, 1]} : vector<8x192xf32> to vector<8x64xf32>
    %71 = vector.extract_strided_slice %66 {offsets = [0, 128], sizes = [8, 64], strides = [1, 1]} : vector<8x192xf32> to vector<8x64xf32>
    %72 = arith.mulf %70, %55 : vector<8x64xf32>
    %73 = arith.mulf %69, %68 : vector<8x64xf32>
    %74 = arith.addf %72, %73 : vector<8x64xf32>
    %75 = math.tanh %74 : vector<8x64xf32>
    %76 = arith.mulf %71, %75 : vector<8x64xf32>
    %c2_27 = arith.constant 2 : index
    %c0_28 = arith.constant 0 : index
    %c0_29 = arith.constant 0 : index
    %77 = vector.load %arg1[%c2_27, %c0_28, %c0_29] : memref<8x8x64xf32, #tpu.memory_space<vmem>>, vector<1x8x64xf32>
    %78 = vector.shape_cast %77 : vector<1x8x64xf32> to vector<8x64xf32>
    %cst_30 = arith.constant 0.000000e+00 : f32
    %79 = vector.broadcast %cst_30 : f32 to vector<8x64xf32>
    %80 = arith.cmpf one, %78, %79 : vector<8x64xf32>
    %81 = arith.select %80, %74, %55 : vector<8x64xi1>, vector<8x64xf32>
    %82 = arith.select %80, %76, %56 : vector<8x64xi1>, vector<8x64xf32>
    %cst_31 = arith.constant dense<0.000000e+00> : vector<8x256xf32>
    %83 = tpu.matmul %82, %0, %cst_31 {dimension_numbers = #tpu.dot_dimension_numbers<[1], [0], [0], [1], [0, 0, 1, 1], [], []>} : vector<8x64xf32>, vector<64x256xf32>, vector<8x256xf32> -> vector<8x256xf32>
    %c3 = arith.constant 3 : index
    %c0_32 = arith.constant 0 : index
    %c0_33 = arith.constant 0 : index
    %84 = vector.load %arg0[%c3, %c0_32, %c0_33] : memref<8x8x256xf32, #tpu.memory_space<vmem>>, vector<1x8x256xf32>
    %85 = vector.shape_cast %84 : vector<1x8x256xf32> to vector<8x256xf32>
    %86 = arith.addf %83, %85 : vector<8x256xf32>
    %87 = vector.extract_strided_slice %86 {offsets = [0, 0], sizes = [8, 192], strides = [1, 1]} : vector<8x256xf32> to vector<8x192xf32>
    %88 = arith.negf %87 : vector<8x192xf32>
    %89 = math.exp %88 : vector<8x192xf32>
    %cst_34 = arith.constant 1.000000e+00 : f32
    %90 = vector.broadcast %cst_34 : f32 to vector<8x192xf32>
    %91 = arith.addf %90, %89 : vector<8x192xf32>
    %92 = arith.divf %90, %91 : vector<8x192xf32>
    %93 = vector.extract_strided_slice %86 {offsets = [0, 192], sizes = [8, 64], strides = [1, 1]} : vector<8x256xf32> to vector<8x64xf32>
    %94 = math.tanh %93 : vector<8x64xf32>
    %95 = vector.extract_strided_slice %92 {offsets = [0, 0], sizes = [8, 64], strides = [1, 1]} : vector<8x192xf32> to vector<8x64xf32>
    %96 = vector.extract_strided_slice %92 {offsets = [0, 64], sizes = [8, 64], strides = [1, 1]} : vector<8x192xf32> to vector<8x64xf32>
    %97 = vector.extract_strided_slice %92 {offsets = [0, 128], sizes = [8, 64], strides = [1, 1]} : vector<8x192xf32> to vector<8x64xf32>
    %98 = arith.mulf %96, %81 : vector<8x64xf32>
    %99 = arith.mulf %95, %94 : vector<8x64xf32>
    %100 = arith.addf %98, %99 : vector<8x64xf32>
    %101 = math.tanh %100 : vector<8x64xf32>
    %102 = arith.mulf %97, %101 : vector<8x64xf32>
    %c3_35 = arith.constant 3 : index
    %c0_36 = arith.constant 0 : index
    %c0_37 = arith.constant 0 : index
    %103 = vector.load %arg1[%c3_35, %c0_36, %c0_37] : memref<8x8x64xf32, #tpu.memory_space<vmem>>, vector<1x8x64xf32>
    %104 = vector.shape_cast %103 : vector<1x8x64xf32> to vector<8x64xf32>
    %cst_38 = arith.constant 0.000000e+00 : f32
    %105 = vector.broadcast %cst_38 : f32 to vector<8x64xf32>
    %106 = arith.cmpf one, %104, %105 : vector<8x64xf32>
    %107 = arith.select %106, %100, %81 : vector<8x64xi1>, vector<8x64xf32>
    %108 = arith.select %106, %102, %82 : vector<8x64xi1>, vector<8x64xf32>
    %cst_39 = arith.constant dense<0.000000e+00> : vector<8x256xf32>
    %109 = tpu.matmul %108, %0, %cst_39 {dimension_numbers = #tpu.dot_dimension_numbers<[1], [0], [0], [1], [0, 0, 1, 1], [], []>} : vector<8x64xf32>, vector<64x256xf32>, vector<8x256xf32> -> vector<8x256xf32>
    %c4 = arith.constant 4 : index
    %c0_40 = arith.constant 0 : index
    %c0_41 = arith.constant 0 : index
    %110 = vector.load %arg0[%c4, %c0_40, %c0_41] : memref<8x8x256xf32, #tpu.memory_space<vmem>>, vector<1x8x256xf32>
    %111 = vector.shape_cast %110 : vector<1x8x256xf32> to vector<8x256xf32>
    %112 = arith.addf %109, %111 : vector<8x256xf32>
    %113 = vector.extract_strided_slice %112 {offsets = [0, 0], sizes = [8, 192], strides = [1, 1]} : vector<8x256xf32> to vector<8x192xf32>
    %114 = arith.negf %113 : vector<8x192xf32>
    %115 = math.exp %114 : vector<8x192xf32>
    %cst_42 = arith.constant 1.000000e+00 : f32
    %116 = vector.broadcast %cst_42 : f32 to vector<8x192xf32>
    %117 = arith.addf %116, %115 : vector<8x192xf32>
    %118 = arith.divf %116, %117 : vector<8x192xf32>
    %119 = vector.extract_strided_slice %112 {offsets = [0, 192], sizes = [8, 64], strides = [1, 1]} : vector<8x256xf32> to vector<8x64xf32>
    %120 = math.tanh %119 : vector<8x64xf32>
    %121 = vector.extract_strided_slice %118 {offsets = [0, 0], sizes = [8, 64], strides = [1, 1]} : vector<8x192xf32> to vector<8x64xf32>
    %122 = vector.extract_strided_slice %118 {offsets = [0, 64], sizes = [8, 64], strides = [1, 1]} : vector<8x192xf32> to vector<8x64xf32>
    %123 = vector.extract_strided_slice %118 {offsets = [0, 128], sizes = [8, 64], strides = [1, 1]} : vector<8x192xf32> to vector<8x64xf32>
    %124 = arith.mulf %122, %107 : vector<8x64xf32>
    %125 = arith.mulf %121, %120 : vector<8x64xf32>
    %126 = arith.addf %124, %125 : vector<8x64xf32>
    %127 = math.tanh %126 : vector<8x64xf32>
    %128 = arith.mulf %123, %127 : vector<8x64xf32>
    %c4_43 = arith.constant 4 : index
    %c0_44 = arith.constant 0 : index
    %c0_45 = arith.constant 0 : index
    %129 = vector.load %arg1[%c4_43, %c0_44, %c0_45] : memref<8x8x64xf32, #tpu.memory_space<vmem>>, vector<1x8x64xf32>
    %130 = vector.shape_cast %129 : vector<1x8x64xf32> to vector<8x64xf32>
    %cst_46 = arith.constant 0.000000e+00 : f32
    %131 = vector.broadcast %cst_46 : f32 to vector<8x64xf32>
    %132 = arith.cmpf one, %130, %131 : vector<8x64xf32>
    %133 = arith.select %132, %126, %107 : vector<8x64xi1>, vector<8x64xf32>
    %134 = arith.select %132, %128, %108 : vector<8x64xi1>, vector<8x64xf32>
    %cst_47 = arith.constant dense<0.000000e+00> : vector<8x256xf32>
    %135 = tpu.matmul %134, %0, %cst_47 {dimension_numbers = #tpu.dot_dimension_numbers<[1], [0], [0], [1], [0, 0, 1, 1], [], []>} : vector<8x64xf32>, vector<64x256xf32>, vector<8x256xf32> -> vector<8x256xf32>
    %c5 = arith.constant 5 : index
    %c0_48 = arith.constant 0 : index
    %c0_49 = arith.constant 0 : index
    %136 = vector.load %arg0[%c5, %c0_48, %c0_49] : memref<8x8x256xf32, #tpu.memory_space<vmem>>, vector<1x8x256xf32>
    %137 = vector.shape_cast %136 : vector<1x8x256xf32> to vector<8x256xf32>
    %138 = arith.addf %135, %137 : vector<8x256xf32>
    %139 = vector.extract_strided_slice %138 {offsets = [0, 0], sizes = [8, 192], strides = [1, 1]} : vector<8x256xf32> to vector<8x192xf32>
    %140 = arith.negf %139 : vector<8x192xf32>
    %141 = math.exp %140 : vector<8x192xf32>
    %cst_50 = arith.constant 1.000000e+00 : f32
    %142 = vector.broadcast %cst_50 : f32 to vector<8x192xf32>
    %143 = arith.addf %142, %141 : vector<8x192xf32>
    %144 = arith.divf %142, %143 : vector<8x192xf32>
    %145 = vector.extract_strided_slice %138 {offsets = [0, 192], sizes = [8, 64], strides = [1, 1]} : vector<8x256xf32> to vector<8x64xf32>
    %146 = math.tanh %145 : vector<8x64xf32>
    %147 = vector.extract_strided_slice %144 {offsets = [0, 0], sizes = [8, 64], strides = [1, 1]} : vector<8x192xf32> to vector<8x64xf32>
    %148 = vector.extract_strided_slice %144 {offsets = [0, 64], sizes = [8, 64], strides = [1, 1]} : vector<8x192xf32> to vector<8x64xf32>
    %149 = vector.extract_strided_slice %144 {offsets = [0, 128], sizes = [8, 64], strides = [1, 1]} : vector<8x192xf32> to vector<8x64xf32>
    %150 = arith.mulf %148, %133 : vector<8x64xf32>
    %151 = arith.mulf %147, %146 : vector<8x64xf32>
    %152 = arith.addf %150, %151 : vector<8x64xf32>
    %153 = math.tanh %152 : vector<8x64xf32>
    %154 = arith.mulf %149, %153 : vector<8x64xf32>
    %c5_51 = arith.constant 5 : index
    %c0_52 = arith.constant 0 : index
    %c0_53 = arith.constant 0 : index
    %155 = vector.load %arg1[%c5_51, %c0_52, %c0_53] : memref<8x8x64xf32, #tpu.memory_space<vmem>>, vector<1x8x64xf32>
    %156 = vector.shape_cast %155 : vector<1x8x64xf32> to vector<8x64xf32>
    %cst_54 = arith.constant 0.000000e+00 : f32
    %157 = vector.broadcast %cst_54 : f32 to vector<8x64xf32>
    %158 = arith.cmpf one, %156, %157 : vector<8x64xf32>
    %159 = arith.select %158, %152, %133 : vector<8x64xi1>, vector<8x64xf32>
    %160 = arith.select %158, %154, %134 : vector<8x64xi1>, vector<8x64xf32>
    %cst_55 = arith.constant dense<0.000000e+00> : vector<8x256xf32>
    %161 = tpu.matmul %160, %0, %cst_55 {dimension_numbers = #tpu.dot_dimension_numbers<[1], [0], [0], [1], [0, 0, 1, 1], [], []>} : vector<8x64xf32>, vector<64x256xf32>, vector<8x256xf32> -> vector<8x256xf32>
    %c6 = arith.constant 6 : index
    %c0_56 = arith.constant 0 : index
    %c0_57 = arith.constant 0 : index
    %162 = vector.load %arg0[%c6, %c0_56, %c0_57] : memref<8x8x256xf32, #tpu.memory_space<vmem>>, vector<1x8x256xf32>
    %163 = vector.shape_cast %162 : vector<1x8x256xf32> to vector<8x256xf32>
    %164 = arith.addf %161, %163 : vector<8x256xf32>
    %165 = vector.extract_strided_slice %164 {offsets = [0, 0], sizes = [8, 192], strides = [1, 1]} : vector<8x256xf32> to vector<8x192xf32>
    %166 = arith.negf %165 : vector<8x192xf32>
    %167 = math.exp %166 : vector<8x192xf32>
    %cst_58 = arith.constant 1.000000e+00 : f32
    %168 = vector.broadcast %cst_58 : f32 to vector<8x192xf32>
    %169 = arith.addf %168, %167 : vector<8x192xf32>
    %170 = arith.divf %168, %169 : vector<8x192xf32>
    %171 = vector.extract_strided_slice %164 {offsets = [0, 192], sizes = [8, 64], strides = [1, 1]} : vector<8x256xf32> to vector<8x64xf32>
    %172 = math.tanh %171 : vector<8x64xf32>
    %173 = vector.extract_strided_slice %170 {offsets = [0, 0], sizes = [8, 64], strides = [1, 1]} : vector<8x192xf32> to vector<8x64xf32>
    %174 = vector.extract_strided_slice %170 {offsets = [0, 64], sizes = [8, 64], strides = [1, 1]} : vector<8x192xf32> to vector<8x64xf32>
    %175 = vector.extract_strided_slice %170 {offsets = [0, 128], sizes = [8, 64], strides = [1, 1]} : vector<8x192xf32> to vector<8x64xf32>
    %176 = arith.mulf %174, %159 : vector<8x64xf32>
    %177 = arith.mulf %173, %172 : vector<8x64xf32>
    %178 = arith.addf %176, %177 : vector<8x64xf32>
    %179 = math.tanh %178 : vector<8x64xf32>
    %180 = arith.mulf %175, %179 : vector<8x64xf32>
    %c6_59 = arith.constant 6 : index
    %c0_60 = arith.constant 0 : index
    %c0_61 = arith.constant 0 : index
    %181 = vector.load %arg1[%c6_59, %c0_60, %c0_61] : memref<8x8x64xf32, #tpu.memory_space<vmem>>, vector<1x8x64xf32>
    %182 = vector.shape_cast %181 : vector<1x8x64xf32> to vector<8x64xf32>
    %cst_62 = arith.constant 0.000000e+00 : f32
    %183 = vector.broadcast %cst_62 : f32 to vector<8x64xf32>
    %184 = arith.cmpf one, %182, %183 : vector<8x64xf32>
    %185 = arith.select %184, %178, %159 : vector<8x64xi1>, vector<8x64xf32>
    %186 = arith.select %184, %180, %160 : vector<8x64xi1>, vector<8x64xf32>
    %cst_63 = arith.constant dense<0.000000e+00> : vector<8x256xf32>
    %187 = tpu.matmul %186, %0, %cst_63 {dimension_numbers = #tpu.dot_dimension_numbers<[1], [0], [0], [1], [0, 0, 1, 1], [], []>} : vector<8x64xf32>, vector<64x256xf32>, vector<8x256xf32> -> vector<8x256xf32>
    %c7 = arith.constant 7 : index
    %c0_64 = arith.constant 0 : index
    %c0_65 = arith.constant 0 : index
    %188 = vector.load %arg0[%c7, %c0_64, %c0_65] : memref<8x8x256xf32, #tpu.memory_space<vmem>>, vector<1x8x256xf32>
    %189 = vector.shape_cast %188 : vector<1x8x256xf32> to vector<8x256xf32>
    %190 = arith.addf %187, %189 : vector<8x256xf32>
    %191 = vector.extract_strided_slice %190 {offsets = [0, 0], sizes = [8, 192], strides = [1, 1]} : vector<8x256xf32> to vector<8x192xf32>
    %192 = arith.negf %191 : vector<8x192xf32>
    %193 = math.exp %192 : vector<8x192xf32>
    %cst_66 = arith.constant 1.000000e+00 : f32
    %194 = vector.broadcast %cst_66 : f32 to vector<8x192xf32>
    %195 = arith.addf %194, %193 : vector<8x192xf32>
    %196 = arith.divf %194, %195 : vector<8x192xf32>
    %197 = vector.extract_strided_slice %190 {offsets = [0, 192], sizes = [8, 64], strides = [1, 1]} : vector<8x256xf32> to vector<8x64xf32>
    %198 = math.tanh %197 : vector<8x64xf32>
    %199 = vector.extract_strided_slice %196 {offsets = [0, 0], sizes = [8, 64], strides = [1, 1]} : vector<8x192xf32> to vector<8x64xf32>
    %200 = vector.extract_strided_slice %196 {offsets = [0, 64], sizes = [8, 64], strides = [1, 1]} : vector<8x192xf32> to vector<8x64xf32>
    %201 = vector.extract_strided_slice %196 {offsets = [0, 128], sizes = [8, 64], strides = [1, 1]} : vector<8x192xf32> to vector<8x64xf32>
    %202 = arith.mulf %200, %185 : vector<8x64xf32>
    %203 = arith.mulf %199, %198 : vector<8x64xf32>
    %204 = arith.addf %202, %203 : vector<8x64xf32>
    %205 = math.tanh %204 : vector<8x64xf32>
    %206 = arith.mulf %201, %205 : vector<8x64xf32>
    %c7_67 = arith.constant 7 : index
    %c0_68 = arith.constant 0 : index
    %c0_69 = arith.constant 0 : index
    %207 = vector.load %arg1[%c7_67, %c0_68, %c0_69] : memref<8x8x64xf32, #tpu.memory_space<vmem>>, vector<1x8x64xf32>
    %208 = vector.shape_cast %207 : vector<1x8x64xf32> to vector<8x64xf32>
    %cst_70 = arith.constant 0.000000e+00 : f32
    %209 = vector.broadcast %cst_70 : f32 to vector<8x64xf32>
    %210 = arith.cmpf one, %208, %209 : vector<8x64xf32>
    %211 = arith.select %210, %206, %186 : vector<8x64xi1>, vector<8x64xf32>
    %212 = vector.extract_strided_slice %211 {offsets = [0, 0], sizes = [8, 32], strides = [1, 1]} : vector<8x64xf32> to vector<8x32xf32>
    %213 = vector.extract_strided_slice %211 {offsets = [0, 32], sizes = [8, 32], strides = [1, 1]} : vector<8x64xf32> to vector<8x32xf32>
    %214 = arith.addf %212, %213 : vector<8x32xf32>
    %cst_71 = arith.constant dense<0.000000e+00> : vector<8x8xf32>
    %215 = tpu.matmul %214, %1, %cst_71 {dimension_numbers = #tpu.dot_dimension_numbers<[1], [0], [0], [1], [0, 0, 1, 1], [], []>} : vector<8x32xf32>, vector<32x8xf32>, vector<8x8xf32> -> vector<8x8xf32>
    %216 = vector.broadcast %2 : vector<1x8xf32> to vector<8x8xf32>
    %217 = arith.addf %215, %216 : vector<8x8xf32>
    %c0_72 = arith.constant 0 : index
    %c0_73 = arith.constant 0 : index
    %218 = vector.load %arg5[%c0_72, %c0_73] : memref<8x8xf32, #tpu.memory_space<vmem>>, vector<8x8xf32>
    tpu.vector_store %arg5[%c0_72, %c0_73], %217 {strides = array<i32>} : memref<8x8xf32, #tpu.memory_space<vmem>>, vector<8x8xf32>,
    return
  }
}

</mosaic_0001>

<bundles_post_ra>
// kernel: tpu_custom_call.1
= control target key start
LH: loop header
LB: loop body
LE: loop exit
PB: predicated region body
PF: predicated region fallthrough
CT: control target
= control target key end

     0   :  { %10 = vsyncpa [#allocation3], 0  ;;  %s1659_s0 = inlined_call_operand.hbm [shape: f32[8,8,256], index: 0, kind: input, shape index: {}]   ;;  %s1660_s1 = inlined_call_operand.hbm [shape: f32[8,8,64], index: 1, kind: input, shape index: {}]   ;;  %s1661_s2 = inlined_call_operand.hbm [shape: f32[64,256], index: 2, kind: input, shape index: {}]   ;;  %s1662_s3 = inlined_call_operand.vmem [shape: f32[32,8], index: 3, kind: input, shape index: {}]   ;;  %s1663_s4 = inlined_call_operand.vmem [shape: f32[1,8], index: 4, kind: input, shape index: {}]   ;;  %s1664_s5 = inlined_call_operand.hbm [shape: f32[8,8], index: 5, kind: output, shape index: {}]  }
   0x1   :  { %11 = vsyncpa [#allocation6], 0 }
   0x2   :  { %12 = vsyncpa [#allocation4], 0  ;;  %s1371_s18 = smov [#allocation5]  }
   0x3   :  { %s30_s19 = sshll.u32 %s1371_s18, 4  ;;  %s31_s19 = int_to_ptr.vmem [resolvable:$true] %s30_s19 }
   0x4   :  { %s1293_s20 = scalar_lea.vmem %s31_s19, 1024  ;;  %p1298_p1 = scmp.lt.s32.totalorder %s31_s19, %s31_s19 }
   0x5   :  { %p1294_p0 = scmp.ne.s32.totalorder %s31_s19, %s1293_s20  ;;  %p1299_p2 = scmp.lt.s32.totalorder %s1293_s20, %s1293_s20 }
   0x7   :  { %p1300_p3 = por %p1299_p2, %p1298_p1 }
   0x9   :  { %p1301_p4 = pnand %p1300_p3, %p1294_p0 }
   0xb   :  { %1304 = shalt.err (!%p1301_p4)
}
   0xc   :  { %s1372_s21 = smov 128   ;;  %s1373_s22 = smov 8  }
   0xd   :  { %36 = dma.hbm_to_vmem [thread:$0]  %s1660_s1, 1024, %s31_s19, [#allocation6], %s1372_s21, %s1372_s21, %s1373_s22  }
   0xe   :  { %s1374_s25 = smov [#allocation2]  }
   0xf   :  { %s18_s26 = sshll.u32 %s1374_s25, 4  ;;  %s19_s26 = int_to_ptr.vmem [resolvable:$true] %s18_s26 }
  0x10   :  { %s1313_s27 = scalar_lea.vmem %s19_s26, 2048  ;;  %p1318_p6 = scmp.lt.s32.totalorder %s19_s26, %s19_s26 }
  0x11   :  { %p1314_p5 = scmp.ne.s32.totalorder %s19_s26, %s1313_s27  ;;  %p1319_p7 = scmp.lt.s32.totalorder %s1313_s27, %s1313_s27 }
  0x13   :  { %p1320_p8 = por %p1319_p7, %p1318_p6 }
  0x15   :  { %p1321_p9 = pnand %p1320_p8, %p1314_p5 }
  0x17   :  { %1324 = shalt.err (!%p1321_p9)
}
  0x18   :  { %s1375_s28 = smov 256   ;;  %s1376_s29 = smov 16  }
  0x19   :  { %24 = dma.hbm_to_vmem [thread:$0]  %s1659_s0, 2048, %s19_s26, [#allocation3], %s1375_s28, %s1375_s28, %s1376_s29  }
  0x1a   :  { %s1377_s7 = smov [#allocation7]  }
  0x1b   :  { %s42_s8 = sshll.u32 %s1377_s7, 4  ;;  %s43_s8 = int_to_ptr.vmem [resolvable:$true] %s42_s8 }
  0x1c   :  { %s1333_s1 = scalar_lea.vmem %s43_s8, 2048  ;;  %p1338_p11 = scmp.lt.s32.totalorder %s43_s8, %s43_s8 }
  0x1d   :  { %p1334_p10 = scmp.ne.s32.totalorder %s43_s8, %s1333_s1  ;;  %p1339_p12 = scmp.lt.s32.totalorder %s1333_s1, %s1333_s1 }
  0x1f   :  { %p1340_p13 = por %p1339_p12, %p1338_p11 }
  0x21   :  { %p1341_p0 = pnand %p1340_p13, %p1334_p10 }
  0x23   :  { %1344 = shalt.err (!%p1341_p0)
}
  0x24   :  { %48 = dma.hbm_to_vmem [thread:$0]  %s1661_s2, 2048, %s43_s8, [#allocation6], %s1375_s28, %s1375_s28, %s1376_s29  }
  0x25   :  { %1365 = dma.done.wait [#allocation3], 2048  }
  0x26   :  { %1366 = vsyncadd [#allocation3], 4294965248 }
  0x27   :  { %1367 = dma.done.wait [#allocation6], 3072  }
  0x28   :  { %1368 = vsyncadd [#allocation6], 4294964224  ;;  %v1378_v0 = vmov 0.0   ;;  %v1424_v1 = vld [vmem:[#allocation7 + $0x78] sm:$0xff]  ;;  %v1426_v2 = vld [vmem:[#allocation7 + $0x70] sm:$0xff]  ;;  %s1379_s0 = smov 64  }
  0x29   :  { %153 = vmatprep.mubr.f32.mxu0 %v1378_v0  ;;  %268 = vmatprep.mubr.f32.mxu1 %v1378_v0  ;;  %v1428_v3 = vld [vmem:[#allocation7 + $0x68] sm:$0xff]  ;;  %v1431_v4 = vld [vmem:[#allocation7 + $0x60] sm:$0xff]  ;;  %v1435_v5 = vld [vmem:[#allocation7 + $0x58] sm:$0xff]  ;;  %vm85_vm1 = vcmask 523264   ;;  %vm1380_vm8 = vmmov 0   ;;  %s1381_s18 = smov 96  }
  0x2a   :  { %105 = vmatprep.subr.mxu0 %v1424_v1  ;;  %220 = vmatprep.subr.mxu1 %v1424_v1  ;;  %v1439_v6 = vld [vmem:[#allocation7 + $0x50] sm:$0xff]  ;;  %v1443_v7 = vld [vmem:[#allocation7 + $0x48] sm:$0xff]  ;;  %v1447_v8 = vld [vmem:[#allocation7 + $0x40] sm:$0xff]  ;;  %vm1044_vm10 = vcmask 261120   ;;  %vm1118_vm11 = vcmask 64512  }
  0x2b   :  { %106 = vmatpush1.msra.mxu0 %v1426_v2  ;;  %221 = vmatpush1.msra.mxu1 %v1426_v2  ;;  %v1451_v9 = vld [vmem:[#allocation7 + $0x38] sm:$0xff]  ;;  %v1455_v10 = vld [vmem:[#allocation7 + $0x30] sm:$0xff]  ;;  %v1459_v11 = vld [vmem:[#allocation7 + $0x28] sm:$0xff] }
  0x2c   :  { %107 = vmatprep.subr.mxu0 %v1428_v3  ;;  %222 = vmatprep.subr.mxu1 %v1428_v3  ;;  %v1463_v12 = vld [vmem:[#allocation7 + $0x20] sm:$0xff]  ;;  %v1467_v13 = vld [vmem:[#allocation7 + $0x18] sm:$0xff]  ;;  %v1471_v14 = vld [vmem:[#allocation7 + $0x10] sm:$0xff] }
  0x2d   :  { %108 = vmatpush1.msra.mxu0 %v1431_v4  ;;  %223 = vmatpush1.msra.mxu1 %v1431_v4  ;;  %v1475_v15 = vld [vmem:[#allocation7 + $0x8] sm:$0xff]  ;;  %v1479_v16 = vld [vmem:[#allocation7] sm:$0xff]  ;;  %v200_v45 = vld [vmem:[#allocation2 + $0x18] sm:$0xff] }
  0x2e   :  { %109 = vmatprep.subr.mxu0 %v1435_v5  ;;  %224 = vmatprep.subr.mxu1 %v1435_v5  ;;  %v84_v18 = vld [vmem:[#allocation2 + $0x8] sm:$0xff]  ;;  %v83_v22 = vld [vmem:[#allocation2] sm:$0xff]  ;;  %v199_v49 = vld [vmem:[#allocation2 + $0x10] sm:$0xff] }
  0x2f   :  { %110 = vmatpush1.msra.mxu0 %v1439_v6  ;;  %225 = vmatpush1.msra.mxu1 %v1439_v6  ;;  %v190_v37 = vld [vmem:[#allocation5] sm:$0xff] }
  0x30   :  { %111 = vmatprep.subr.mxu0 %v1443_v7  ;;  %226 = vmatprep.subr.mxu1 %v1443_v7  ;;  %vm191_vm0 = vcmp.ne.f32.partialorder %v190_v37, 0.0 }
  0x31   :  { %112 = vmatpush1.msra.mxu0 %v1447_v8  ;;  %227 = vmatpush1.msra.mxu1 %v1447_v8 }
  0x32   :  { %113 = vmatprep.subr.mxu0 %v1451_v9  ;;  %228 = vmatprep.subr.mxu1 %v1451_v9 }
  0x33   :  { %114 = vmatpush1.msra.mxu0 %v1455_v10  ;;  %229 = vmatpush1.msra.mxu1 %v1455_v10 }
  0x34   :  { %115 = vmatprep.subr.mxu0 %v1459_v11  ;;  %230 = vmatprep.subr.mxu1 %v1459_v11 }
  0x35   :  { %116 = vmatpush1.msra.mxu0 %v1463_v12  ;;  %231 = vmatpush1.msra.mxu1 %v1463_v12 }
  0x36   :  { %117 = vmatprep.subr.mxu0 %v1467_v13  ;;  %232 = vmatprep.subr.mxu1 %v1467_v13 }
  0x37   :  { %118 = vmatpush1.msra.mxu0 %v1471_v14  ;;  %233 = vmatpush1.msra.mxu1 %v1471_v14 }
  0x38   :  { %119 = vmatprep.subr.mxu0 %v1475_v15  ;;  %234 = vmatprep.subr.mxu1 %v1475_v15 }
  0x39   :  { %120 = vmatpush1.msra.mxu0 %v1479_v16  ;;  %235 = vmatpush1.msra.mxu1 %v1479_v16 }
  0x3a   :  { %154 = vmatmul.mubr.f32.vlgmr.msra.gmra.mxu0 %v1378_v0  ;;  %340 = vmatprep.subr.mxu0 %v1424_v1 }
  0x3b   :  { %341 = vmatpush1.msra.mxu0 %v1426_v2  ;;  %388 = vmatprep.mubr.f32.mxu0 %v1378_v0 }
  0x3c   :  { %342 = vmatprep.subr.mxu0 %v1428_v3  ;;  %460 = vmatprep.subr.mxu1 %v1424_v1 }
  0x3d   :  { %343 = vmatpush1.msra.mxu0 %v1431_v4 }
  0x3e   :  { %344 = vmatprep.subr.mxu0 %v1435_v5 }
  0x3f   :  { %345 = vmatpush1.msra.mxu0 %v1439_v6 }
  0x40   :  { %346 = vmatprep.subr.mxu0 %v1443_v7 }
  0x41   :  { %347 = vmatpush1.msra.mxu0 %v1447_v8 }
  0x42   :  { %348 = vmatprep.subr.mxu0 %v1451_v9 }
  0x43   :  { %349 = vmatpush1.msra.mxu0 %v1455_v10 }
  0x44   :  { %350 = vmatprep.subr.mxu0 %v1459_v11 }
  0x45   :  { %351 = vmatpush1.msra.mxu0 %v1463_v12 }
  0x46   :  { %352 = vmatprep.subr.mxu0 %v1467_v13 }
  0x47   :  { %353 = vmatpush1.msra.mxu0 %v1471_v14 }
  0x48   :  { %354 = vmatprep.subr.mxu0 %v1475_v15 }
  0x49   :  { %355 = vmatpush1.msra.mxu0 %v1479_v16 }
  0x4a   :  { %580 = vmatprep.subr.mxu0 %v1424_v1 }
  0xfa   :  { %v155_v17 = vpop.f32.mrf.mxu0 }
  0xfb   :  { %v156_v23 = vadd.f32 %v155_v17, %v83_v22  ;;  %v310_v17 = vld [vmem:[#allocation5 + $0x8] sm:$0xff] }
  0xfc   :  { %v157_v19 = vpop.f32.mrf.mxu0  ;;  %vm311_vm2 = vcmp.ne.f32.partialorder %v310_v17, 0.0 }
  0xfd   :  { %v158_v20 = vadd.f32 %v157_v19, %v84_v18  ;;  %v1136_v24 = vmul.f32 -1.442695, %v156_v23 }
  0xff   :  { %1189 = vtanh.f32 %v158_v20  ;;  %v1137_v34 = vmul.f32 -1.442695, %v158_v20 }
 0x100   :  { %1191 = vpow2.f32 %v1136_v24 }
 0x10c   :  { %v1190_v21 = vpop.eup %1189 }
 0x10d   :  { %175 = vrot.lane.b32.xlu0 %v1190_v21, %s1379_s0  ;;  %v1192_v25 = vpop.eup %1191 }
 0x10e   :  { %v166_v26 = vadd.f32 1.0, %v1192_v25 }
 0x110   :  { %1193 = vrcp.f32 %v166_v26  ;;  %v320_v26 = vld [vmem:[#allocation2 + $0x28] sm:$0xff] }
 0x11d   :  { %v1194_v27 = vpop.eup %1193 }
 0x11e   :  { %v173_v30 = vmul.f32 0.0, %v1194_v27 }
 0x17f   :  { %v176_v28 = vpop.permute.xlu0 %175 }
 0x180   :  { %v178_v29 = vmul.f32 %v1194_v27, %v176_v28 }
 0x182   :  { %180 = vrot.lane.b32.xlu0 %v178_v29, %s1379_s0 }
 0x1f4   :  { %v181_v31 = vpop.permute.xlu0 %180 }
 0x1f5   :  { %v183_v32 = vadd.f32 %v181_v31, %v173_v30  ;;  %v319_v30 = vld [vmem:[#allocation2 + $0x20] sm:$0xff] }
 0x1f7   :  { %1195 = vtanh.f32 %v183_v32 }
 0x1f8   :  { %1197 = vpow2.f32 %v1137_v34 }
 0x204   :  { %v1196_v33 = vpop.eup %1195 }
 0x205   :  { %186 = vrot.lane.b32.xlu1 %v1196_v33, %s1379_s0  ;;  %v1198_v35 = vpop.eup %1197 }
 0x206   :  { %v167_v36 = vadd.f32 1.0, %v1198_v35 }
 0x208   :  { %1199 = vrcp.f32 %v167_v36 }
 0x209   :  { %193 = vrot.lane.b32.xlu1 %v183_v32, %s1379_s0 }
 0x215   :  { %v1200_v38 = vpop.eup %1199 }
 0x277   :  { %v187_v39 = vpop.permute.xlu1 %186 }
 0x278   :  { %v189_v40 = vmul.f32 %v1200_v38, %v187_v39 }
 0x27a   :  { %v197_v41 = vsel %vm191_vm0, %v189_v40, 0.0 }
 0x27b   :  { %1138 = vmatmul.mubr.msk.f32.vlgmr.msra.gmra.mxu1 %vm85_vm1, %v197_v41  ;;  %v194_v42 = vpop.permute.xlu1 %193 }
 0x27c   :  { %v196_v43 = vsel %vm191_vm0, %v194_v42, 0.0  ;;  %461 = vmatpush1.msra.mxu1 %v1426_v2  ;;  %508 = vmatprep.mubr.f32.mxu1 %v1378_v0 }
 0x27d   :  { %289 = vrot.lane.b32.xlu1 %v196_v43, %s1379_s0  ;;  %462 = vmatprep.subr.mxu1 %v1428_v3 }
 0x27e   :  { %463 = vmatpush1.msra.mxu1 %v1431_v4 }
 0x27f   :  { %464 = vmatprep.subr.mxu1 %v1435_v5 }
 0x280   :  { %465 = vmatpush1.msra.mxu1 %v1439_v6 }
 0x281   :  { %466 = vmatprep.subr.mxu1 %v1443_v7 }
 0x282   :  { %467 = vmatpush1.msra.mxu1 %v1447_v8 }
 0x283   :  { %468 = vmatprep.subr.mxu1 %v1451_v9 }
 0x284   :  { %469 = vmatpush1.msra.mxu1 %v1455_v10 }
 0x285   :  { %470 = vmatprep.subr.mxu1 %v1459_v11 }
 0x286   :  { %471 = vmatpush1.msra.mxu1 %v1463_v12 }
 0x287   :  { %472 = vmatprep.subr.mxu1 %v1467_v13 }
 0x288   :  { %473 = vmatpush1.msra.mxu1 %v1471_v14 }
 0x289   :  { %474 = vmatprep.subr.mxu1 %v1475_v15 }
 0x28a   :  { %475 = vmatpush1.msra.mxu1 %v1479_v16 }
 0x28b   :  { %700 = vmatprep.subr.mxu1 %v1424_v1 }
 0x2ef   :  { %v290_v57 = vpop.permute.xlu1 %289 }
 0x33b   :  { %v270_v44 = vpop.f32.mrf.mxu1 }
 0x33c   :  { %v271_v50 = vadd.f32 %v270_v44, %v199_v49 }
 0x33d   :  { %v272_v46 = vpop.f32.mrf.mxu1 }
 0x33e   :  { %v273_v47 = vadd.f32 %v272_v46, %v200_v45  ;;  %v1139_v51 = vmul.f32 -1.442695, %v271_v50  ;;  %v430_v45 = vld [vmem:[#allocation5 + $0x10] sm:$0xff] }
 0x33f   :  { %vm431_vm3 = vcmp.ne.f32.partialorder %v430_v45, 0.0 }
 0x340   :  { %1201 = vtanh.f32 %v273_v47  ;;  %v1140_v62 = vmul.f32 -1.442695, %v273_v47 }
 0x341   :  { %1203 = vpow2.f32 %v1139_v51 }
 0x34d   :  { %v1202_v48 = vpop.eup %1201 }
 0x34e   :  { %294 = vrot.lane.b32.xlu0 %v1202_v48, %s1379_s0  ;;  %v1204_v52 = vpop.eup %1203 }
 0x34f   :  { %v281_v53 = vadd.f32 1.0, %v1204_v52 }
 0x351   :  { %1205 = vrcp.f32 %v281_v53 }
 0x35e   :  { %v1206_v54 = vpop.eup %1205 }
 0x35f   :  { %v292_v58 = vmul.f32 %v1206_v54, %v290_v57 }
 0x3c0   :  { %v295_v55 = vpop.permute.xlu0 %294 }
 0x3c1   :  { %v297_v56 = vmul.f32 %v1206_v54, %v295_v55  ;;  %v440_v54 = vld [vmem:[#allocation2 + $0x38] sm:$0xff] }
 0x3c3   :  { %299 = vrot.lane.b32.xlu0 %v297_v56, %s1379_s0 }
 0x435   :  { %v300_v59 = vpop.permute.xlu0 %299 }
 0x436   :  { %v302_v60 = vadd.f32 %v300_v59, %v292_v58  ;;  %v439_v58 = vld [vmem:[#allocation2 + $0x30] sm:$0xff] }
 0x438   :  { %1207 = vtanh.f32 %v302_v60  ;;  %313 = vrot.lane.b32.xlu0 %v302_v60, %s1379_s0 }
 0x439   :  { %1209 = vpow2.f32 %v1140_v62 }
 0x445   :  { %v1208_v61 = vpop.eup %1207 }
 0x446   :  { %305 = vrot.lane.b32.xlu1 %v1208_v61, %s1379_s0  ;;  %v1210_v63 = vpop.eup %1209 }
 0x447   :  { %v282_v18 = vadd.f32 1.0, %v1210_v63 }
 0x449   :  { %1211 = vrcp.f32 %v282_v18 }
 0x456   :  { %v1212_v21 = vpop.eup %1211 }
 0x4aa   :  { %v314_v19 = vpop.permute.xlu0 %313 }
 0x4ab   :  { %v316_v20 = vsel %vm311_vm2, %v314_v19, %v196_v43 }
 0x4ac   :  { %409 = vrot.lane.b32.xlu0 %v316_v20, %s1379_s0 }
 0x4b8   :  { %v306_v22 = vpop.permute.xlu1 %305 }
 0x4b9   :  { %v308_v23 = vmul.f32 %v1212_v21, %v306_v22 }
 0x4bb   :  { %v317_v24 = vsel %vm311_vm2, %v308_v23, %v197_v41 }
 0x4bc   :  { %1141 = vmatmul.mubr.msk.f32.vlgmr.msra.gmra.mxu0 %vm85_vm1, %v317_v24 }
 0x4bd   :  { %581 = vmatpush1.msra.mxu0 %v1426_v2  ;;  %628 = vmatprep.mubr.f32.mxu0 %v1378_v0 }
 0x4be   :  { %582 = vmatprep.subr.mxu0 %v1428_v3 }
 0x4bf   :  { %583 = vmatpush1.msra.mxu0 %v1431_v4 }
 0x4c0   :  { %584 = vmatprep.subr.mxu0 %v1435_v5 }
 0x4c1   :  { %585 = vmatpush1.msra.mxu0 %v1439_v6 }
 0x4c2   :  { %586 = vmatprep.subr.mxu0 %v1443_v7 }
 0x4c3   :  { %587 = vmatpush1.msra.mxu0 %v1447_v8 }
 0x4c4   :  { %588 = vmatprep.subr.mxu0 %v1451_v9 }
 0x4c5   :  { %589 = vmatpush1.msra.mxu0 %v1455_v10 }
 0x4c6   :  { %590 = vmatprep.subr.mxu0 %v1459_v11 }
 0x4c7   :  { %591 = vmatpush1.msra.mxu0 %v1463_v12 }
 0x4c8   :  { %592 = vmatprep.subr.mxu0 %v1467_v13 }
 0x4c9   :  { %593 = vmatpush1.msra.mxu0 %v1471_v14 }
 0x4ca   :  { %594 = vmatprep.subr.mxu0 %v1475_v15 }
 0x4cb   :  { %595 = vmatpush1.msra.mxu0 %v1479_v16 }
 0x4cc   :  { %820 = vmatprep.subr.mxu0 %v1424_v1 }
 0x51e   :  { %v410_v38 = vpop.permute.xlu0 %409 }
 0x57c   :  { %v390_v25 = vpop.f32.mrf.mxu0 }
 0x57d   :  { %v391_v31 = vadd.f32 %v390_v25, %v319_v30  ;;  %v550_v25 = vld [vmem:[#allocation5 + $0x18] sm:$0xff] }
 0x57e   :  { %v392_v27 = vpop.f32.mrf.mxu0  ;;  %vm551_vm4 = vcmp.ne.f32.partialorder %v550_v25, 0.0 }
 0x57f   :  { %v393_v28 = vadd.f32 %v392_v27, %v320_v26  ;;  %v1142_v32 = vmul.f32 -1.442695, %v391_v31 }
 0x581   :  { %1213 = vtanh.f32 %v393_v28  ;;  %v1143_v43 = vmul.f32 -1.442695, %v393_v28 }
 0x582   :  { %1215 = vpow2.f32 %v1142_v32 }
 0x58e   :  { %v1214_v29 = vpop.eup %1213 }
 0x58f   :  { %414 = vrot.lane.b32.xlu1 %v1214_v29, %s1379_s0  ;;  %v1216_v33 = vpop.eup %1215 }
 0x590   :  { %v401_v34 = vadd.f32 1.0, %v1216_v33 }
 0x592   :  { %1217 = vrcp.f32 %v401_v34  ;;  %v560_v34 = vld [vmem:[#allocation2 + $0x48] sm:$0xff] }
 0x59f   :  { %v1218_v35 = vpop.eup %1217 }
 0x5a0   :  { %v412_v39 = vmul.f32 %v1218_v35, %v410_v38  ;;  %v559_v38 = vld [vmem:[#allocation2 + $0x40] sm:$0xff] }
 0x601   :  { %v415_v36 = vpop.permute.xlu1 %414 }
 0x602   :  { %v417_v37 = vmul.f32 %v1218_v35, %v415_v36 }
 0x604   :  { %419 = vrot.lane.b32.xlu1 %v417_v37, %s1379_s0 }
 0x676   :  { %v420_v40 = vpop.permute.xlu1 %419 }
 0x677   :  { %v422_v41 = vadd.f32 %v420_v40, %v412_v39 }
 0x679   :  { %1219 = vtanh.f32 %v422_v41  ;;  %433 = vrot.lane.b32.xlu1 %v422_v41, %s1379_s0 }
 0x67a   :  { %1221 = vpow2.f32 %v1143_v43 }
 0x686   :  { %v1220_v42 = vpop.eup %1219 }
 0x687   :  { %425 = vrot.lane.b32.xlu0 %v1220_v42, %s1379_s0  ;;  %v1222_v44 = vpop.eup %1221 }
 0x688   :  { %v402_v46 = vadd.f32 1.0, %v1222_v44 }
 0x68a   :  { %1223 = vrcp.f32 %v402_v46 }
 0x697   :  { %v1224_v49 = vpop.eup %1223 }
 0x6eb   :  { %v434_v47 = vpop.permute.xlu1 %433 }
 0x6ec   :  { %v436_v48 = vsel %vm431_vm3, %v434_v47, %v316_v20 }
 0x6ed   :  { %529 = vrot.lane.b32.xlu1 %v436_v48, %s1379_s0 }
 0x6f9   :  { %v426_v50 = vpop.permute.xlu0 %425 }
 0x6fa   :  { %v428_v51 = vmul.f32 %v1224_v49, %v426_v50 }
 0x6fc   :  { %v437_v52 = vsel %vm431_vm3, %v428_v51, %v317_v24 }
 0x6fd   :  { %1144 = vmatmul.mubr.msk.f32.vlgmr.msra.gmra.mxu1 %vm85_vm1, %v437_v52 }
 0x6fe   :  { %701 = vmatpush1.msra.mxu1 %v1426_v2  ;;  %748 = vmatprep.mubr.f32.mxu1 %v1378_v0 }
 0x6ff   :  { %702 = vmatprep.subr.mxu1 %v1428_v3 }
 0x700   :  { %703 = vmatpush1.msra.mxu1 %v1431_v4 }
 0x701   :  { %704 = vmatprep.subr.mxu1 %v1435_v5 }
 0x702   :  { %705 = vmatpush1.msra.mxu1 %v1439_v6 }
 0x703   :  { %706 = vmatprep.subr.mxu1 %v1443_v7 }
 0x704   :  { %707 = vmatpush1.msra.mxu1 %v1447_v8 }
 0x705   :  { %708 = vmatprep.subr.mxu1 %v1451_v9 }
 0x706   :  { %709 = vmatpush1.msra.mxu1 %v1455_v10 }
 0x707   :  { %710 = vmatprep.subr.mxu1 %v1459_v11 }
 0x708   :  { %711 = vmatpush1.msra.mxu1 %v1463_v12 }
 0x709   :  { %712 = vmatprep.subr.mxu1 %v1467_v13 }
 0x70a   :  { %713 = vmatpush1.msra.mxu1 %v1471_v14 }
 0x70b   :  { %714 = vmatprep.subr.mxu1 %v1475_v15 }
 0x70c   :  { %715 = vmatpush1.msra.mxu1 %v1479_v16 }
 0x70d   :  { %940 = vmatprep.subr.mxu1 %v1424_v1 }
 0x75f   :  { %v530_v1 = vpop.permute.xlu1 %529 }
 0x7bd   :  { %v510_v53 = vpop.f32.mrf.mxu1 }
 0x7be   :  { %v511_v59 = vadd.f32 %v510_v53, %v439_v58  ;;  %v670_v53 = vld [vmem:[#allocation5 + $0x20] sm:$0xff] }
 0x7bf   :  { %v512_v55 = vpop.f32.mrf.mxu1  ;;  %vm671_vm5 = vcmp.ne.f32.partialorder %v670_v53, 0.0 }
 0x7c0   :  { %v513_v56 = vadd.f32 %v512_v55, %v440_v54  ;;  %v1145_v60 = vmul.f32 -1.442695, %v511_v59 }
 0x7c2   :  { %1225 = vtanh.f32 %v513_v56  ;;  %v1146_v23 = vmul.f32 -1.442695, %v513_v56 }
 0x7c3   :  { %1227 = vpow2.f32 %v1145_v60 }
 0x7cf   :  { %v1226_v57 = vpop.eup %1225 }
 0x7d0   :  { %534 = vrot.lane.b32.xlu0 %v1226_v57, %s1379_s0  ;;  %v1228_v61 = vpop.eup %1227 }
 0x7d1   :  { %v521_v62 = vadd.f32 1.0, %v1228_v61 }
 0x7d3   :  { %1229 = vrcp.f32 %v521_v62 }
 0x7e0   :  { %v1230_v63 = vpop.eup %1229 }
 0x7e1   :  { %v532_v19 = vmul.f32 %v1230_v63, %v530_v1  ;;  %v790_v1 = vld [vmem:[#allocation5 + $0x28] sm:$0xff] }
 0x7e2   :  { %vm791_vm6 = vcmp.ne.f32.partialorder %v790_v1, 0.0 }
 0x842   :  { %v535_v17 = vpop.permute.xlu0 %534 }
 0x843   :  { %v537_v18 = vmul.f32 %v1230_v63, %v535_v17 }
 0x845   :  { %539 = vrot.lane.b32.xlu0 %v537_v18, %s1379_s0 }
 0x8b7   :  { %v540_v20 = vpop.permute.xlu0 %539 }
 0x8b8   :  { %v542_v21 = vadd.f32 %v540_v20, %v532_v19 }
 0x8ba   :  { %1231 = vtanh.f32 %v542_v21  ;;  %553 = vrot.lane.b32.xlu0 %v542_v21, %s1379_s0 }
 0x8bb   :  { %1233 = vpow2.f32 %v1146_v23 }
 0x8c7   :  { %v1232_v22 = vpop.eup %1231 }
 0x8c8   :  { %545 = vrot.lane.b32.xlu1 %v1232_v22, %s1379_s0  ;;  %v1234_v24 = vpop.eup %1233 }
 0x8c9   :  { %v522_v26 = vadd.f32 1.0, %v1234_v24 }
 0x8cb   :  { %1235 = vrcp.f32 %v522_v26 }
 0x8d8   :  { %v1236_v29 = vpop.eup %1235 }
 0x92c   :  { %v554_v27 = vpop.permute.xlu0 %553 }
 0x92d   :  { %v556_v28 = vsel %vm551_vm4, %v554_v27, %v436_v48  ;;  %v800_v27 = vld [vmem:[#allocation2 + $0x68] sm:$0xff] }
 0x92e   :  { %649 = vrot.lane.b32.xlu0 %v556_v28, %s1379_s0 }
 0x93a   :  { %v546_v30 = vpop.permute.xlu1 %545 }
 0x93b   :  { %v548_v31 = vmul.f32 %v1236_v29, %v546_v30 }
 0x93d   :  { %v557_v32 = vsel %vm551_vm4, %v548_v31, %v437_v52  ;;  %v799_v31 = vld [vmem:[#allocation2 + $0x60] sm:$0xff] }
 0x93e   :  { %1147 = vmatmul.mubr.msk.f32.vlgmr.msra.gmra.mxu0 %vm85_vm1, %v557_v32 }
 0x93f   :  { %821 = vmatpush1.msra.mxu0 %v1426_v2  ;;  %868 = vmatprep.mubr.f32.mxu0 %v1378_v0 }
 0x940   :  { %822 = vmatprep.subr.mxu0 %v1428_v3 }
 0x941   :  { %823 = vmatpush1.msra.mxu0 %v1431_v4 }
 0x942   :  { %824 = vmatprep.subr.mxu0 %v1435_v5 }
 0x943   :  { %825 = vmatpush1.msra.mxu0 %v1439_v6 }
 0x944   :  { %826 = vmatprep.subr.mxu0 %v1443_v7 }
 0x945   :  { %827 = vmatpush1.msra.mxu0 %v1447_v8 }
 0x946   :  { %828 = vmatprep.subr.mxu0 %v1451_v9 }
 0x947   :  { %829 = vmatpush1.msra.mxu0 %v1455_v10 }
 0x948   :  { %830 = vmatprep.subr.mxu0 %v1459_v11 }
 0x949   :  { %831 = vmatpush1.msra.mxu0 %v1463_v12 }
 0x94a   :  { %832 = vmatprep.subr.mxu0 %v1467_v13 }
 0x94b   :  { %833 = vmatpush1.msra.mxu0 %v1471_v14 }
 0x94c   :  { %834 = vmatprep.subr.mxu0 %v1475_v15 }
 0x94d   :  { %835 = vmatpush1.msra.mxu0 %v1479_v16 }
 0x94e   :  { %1166 = vmatprep.subr.mxu0 %v1378_v0 }
 0x9a0   :  { %v650_v46 = vpop.permute.xlu0 %649 }
 0x9fe   :  { %v630_v33 = vpop.f32.mrf.mxu0 }
 0x9ff   :  { %v631_v39 = vadd.f32 %v630_v33, %v559_v38 }
 0xa00   :  { %v632_v35 = vpop.f32.mrf.mxu0 }
 0xa01   :  { %v633_v36 = vadd.f32 %v632_v35, %v560_v34  ;;  %v1148_v40 = vmul.f32 -1.442695, %v631_v39 }
 0xa03   :  { %1237 = vtanh.f32 %v633_v36  ;;  %v1149_v51 = vmul.f32 -1.442695, %v633_v36 }
 0xa04   :  { %1239 = vpow2.f32 %v1148_v40 }
 0xa10   :  { %v1238_v37 = vpop.eup %1237 }
 0xa11   :  { %654 = vrot.lane.b32.xlu1 %v1238_v37, %s1379_s0  ;;  %v1240_v41 = vpop.eup %1239 }
 0xa12   :  { %v641_v42 = vadd.f32 1.0, %v1240_v41 }
 0xa14   :  { %1241 = vrcp.f32 %v641_v42 }
 0xa21   :  { %v1242_v43 = vpop.eup %1241 }
 0xa22   :  { %v652_v47 = vmul.f32 %v1242_v43, %v650_v46  ;;  %v910_v46 = vld [vmem:[#allocation5 + $0x30] sm:$0xff] }
 0xa23   :  { %vm911_vm7 = vcmp.ne.f32.partialorder %v910_v46, 0.0 }
 0xa83   :  { %v655_v44 = vpop.permute.xlu1 %654 }
 0xa84   :  { %v657_v45 = vmul.f32 %v1242_v43, %v655_v44 }
 0xa86   :  { %659 = vrot.lane.b32.xlu1 %v657_v45, %s1379_s0 }
 0xaf8   :  { %v660_v48 = vpop.permute.xlu1 %659 }
 0xaf9   :  { %v662_v49 = vadd.f32 %v660_v48, %v652_v47 }
 0xafb   :  { %1243 = vtanh.f32 %v662_v49  ;;  %673 = vrot.lane.b32.xlu1 %v662_v49, %s1379_s0 }
 0xafc   :  { %1245 = vpow2.f32 %v1149_v51 }
 0xb08   :  { %v1244_v50 = vpop.eup %1243 }
 0xb09   :  { %665 = vrot.lane.b32.xlu0 %v1244_v50, %s1379_s0  ;;  %v1246_v52 = vpop.eup %1245 }
 0xb0a   :  { %v642_v54 = vadd.f32 1.0, %v1246_v52 }
 0xb0c   :  { %1247 = vrcp.f32 %v642_v54 }
 0xb19   :  { %v1248_v57 = vpop.eup %1247 }
 0xb6d   :  { %v674_v55 = vpop.permute.xlu1 %673 }
 0xb6e   :  { %v676_v56 = vsel %vm671_vm5, %v674_v55, %v556_v28  ;;  %v920_v55 = vld [vmem:[#allocation2 + $0x78] sm:$0xff] }
 0xb6f   :  { %769 = vrot.lane.b32.xlu1 %v676_v56, %s1379_s0 }
 0xb7b   :  { %v666_v58 = vpop.permute.xlu0 %665 }
 0xb7c   :  { %v668_v59 = vmul.f32 %v1248_v57, %v666_v58 }
 0xb7e   :  { %v677_v60 = vsel %vm671_vm5, %v668_v59, %v557_v32  ;;  %v919_v59 = vld [vmem:[#allocation2 + $0x70] sm:$0xff] }
 0xb7f   :  { %1150 = vmatmul.mubr.msk.f32.vlgmr.msra.gmra.mxu1 %vm85_vm1, %v677_v60 }
 0xb80   :  { %941 = vmatpush1.msra.mxu1 %v1426_v2  ;;  %988 = vmatprep.mubr.f32.mxu1 %v1378_v0 }
 0xb81   :  { %942 = vmatprep.subr.mxu1 %v1428_v3  ;;  %v680_v3 = vld [vmem:[#allocation2 + $0x58] sm:$0xff] }
 0xb82   :  { %943 = vmatpush1.msra.mxu1 %v1431_v4 }
 0xb83   :  { %944 = vmatprep.subr.mxu1 %v1435_v5 }
 0xb84   :  { %945 = vmatpush1.msra.mxu1 %v1439_v6 }
 0xb85   :  { %946 = vmatprep.subr.mxu1 %v1443_v7  ;;  %v679_v7 = vld [vmem:[#allocation2 + $0x50] sm:$0xff] }
 0xb86   :  { %947 = vmatpush1.msra.mxu1 %v1447_v8 }
 0xb87   :  { %948 = vmatprep.subr.mxu1 %v1451_v9 }
 0xb88   :  { %949 = vmatpush1.msra.mxu1 %v1455_v10 }
 0xb89   :  { %950 = vmatprep.subr.mxu1 %v1459_v11 }
 0xb8a   :  { %951 = vmatpush1.msra.mxu1 %v1463_v12 }
 0xb8b   :  { %952 = vmatprep.subr.mxu1 %v1467_v13 }
 0xb8c   :  { %953 = vmatpush1.msra.mxu1 %v1471_v14 }
 0xb8d   :  { %954 = vmatprep.subr.mxu1 %v1475_v15 }
 0xb8e   :  { %955 = vmatpush1.msra.mxu1 %v1479_v16 }
 0xbe1   :  { %v770_v15 = vpop.permute.xlu1 %769 }
 0xc3f   :  { %v750_v2 = vpop.f32.mrf.mxu1 }
 0xc40   :  { %v751_v8 = vadd.f32 %v750_v2, %v679_v7 }
 0xc41   :  { %v752_v4 = vpop.f32.mrf.mxu1 }
 0xc42   :  { %v753_v5 = vadd.f32 %v752_v4, %v680_v3  ;;  %v1151_v9 = vmul.f32 -1.442695, %v751_v8 }
 0xc44   :  { %1249 = vtanh.f32 %v753_v5  ;;  %v1152_v17 = vmul.f32 -1.442695, %v753_v5 }
 0xc45   :  { %1251 = vpow2.f32 %v1151_v9 }
 0xc51   :  { %v1250_v6 = vpop.eup %1249 }
 0xc52   :  { %774 = vrot.lane.b32.xlu0 %v1250_v6, %s1379_s0  ;;  %v1252_v10 = vpop.eup %1251 }
 0xc53   :  { %v761_v11 = vadd.f32 1.0, %v1252_v10 }
 0xc55   :  { %1253 = vrcp.f32 %v761_v11 }
 0xc62   :  { %v1254_v12 = vpop.eup %1253 }
 0xc63   :  { %v772_v16 = vmul.f32 %v1254_v12, %v770_v15 }
 0xcc4   :  { %v775_v13 = vpop.permute.xlu0 %774 }
 0xcc5   :  { %v777_v14 = vmul.f32 %v1254_v12, %v775_v13  ;;  %v81_v12 = vld [vmem:[%s1662_s3 + $0x18] sm:$0xff]  ;;  %v80_v13 = vld [vmem:[%s1662_s3 + $0x10] sm:$0xff] }
 0xcc7   :  { %779 = vrot.lane.b32.xlu0 %v777_v14, %s1379_s0  ;;  %v79_v14 = vld [vmem:[%s1662_s3 + $0x8] sm:$0xff] }
 0xd39   :  { %v780_v61 = vpop.permute.xlu0 %779 }
 0xd3a   :  { %v782_v62 = vadd.f32 %v780_v61, %v772_v16 }
 0xd3c   :  { %1255 = vtanh.f32 %v782_v62  ;;  %793 = vrot.lane.b32.xlu0 %v782_v62, %s1379_s0 }
 0xd3d   :  { %1257 = vpow2.f32 %v1152_v17  ;;  %v1030_v17 = vld [vmem:[#allocation5 + $0x38] sm:$0xff] }
 0xd3e   :  { %vm1031_vm9 = vcmp.ne.f32.partialorder %v1030_v17, 0.0 }
 0xd49   :  { %v1256_v63 = vpop.eup %1255 }
 0xd4a   :  { %785 = vrot.lane.b32.xlu1 %v1256_v63, %s1379_s0  ;;  %v1258_v18 = vpop.eup %1257  ;;  %v78_v63 = vld [vmem:[%s1662_s3] sm:$0xff]  ;;  %s1382_s3 = smov [#allocation8]  }
 0xd4b   :  { %v762_v19 = vadd.f32 1.0, %v1258_v18  ;;  %s1126_s21 = sshll.u32 %s1382_s3, 4  ;;  %s1127_s21 = int_to_ptr.vmem [resolvable:$true] %s1126_s21 }
 0xd4c   :  { %s1345_s22 = scalar_lea.vmem %s1127_s21, 128  ;;  %p1350_p2 = scmp.lt.s32.totalorder %s1127_s21, %s1127_s21 }
 0xd4d   :  { %1259 = vrcp.f32 %v762_v19  ;;  %p1346_p1 = scmp.ne.s32.totalorder %s1127_s21, %s1345_s22  ;;  %p1351_p3 = scmp.lt.s32.totalorder %s1345_s22, %s1345_s22 }
 0xd4f   :  { %p1352_p4 = por %p1351_p3, %p1350_p2 }
 0xd51   :  { %p1353_p5 = pnand %p1352_p4, %p1346_p1 }
 0xd5a   :  { %v1260_v22 = vpop.eup %1259 }
 0xdae   :  { %v794_v20 = vpop.permute.xlu0 %793 }
 0xdaf   :  { %v796_v21 = vsel %vm791_vm6, %v794_v20, %v676_v56 }
 0xdb0   :  { %889 = vrot.lane.b32.xlu0 %v796_v21, %s1379_s0 }
 0xdbc   :  { %v786_v23 = vpop.permute.xlu1 %785 }
 0xdbd   :  { %v788_v24 = vmul.f32 %v1260_v22, %v786_v23  ;;  %v1159_v23 = vld [vmem:[%s1663_s4] ss:$0 sm:$0xff] }
 0xdbf   :  { %v797_v25 = vsel %vm791_vm6, %v788_v24, %v677_v60 }
 0xdc0   :  { %1153 = vmatmul.mubr.msk.f32.vlgmr.msra.gmra.mxu0 %vm85_vm1, %v797_v25 }
 0xdc1   :  { %1167 = vmatpush3.msra.mxu0 %v81_v12  ;;  %1174 = vmatprep.mubr.msk.f32.mxu0 %vm1380_vm8, %v1378_v0 }
 0xdc2   :  { %1168 = vmatprep.subr.mxu0 %v1378_v0 }
 0xdc3   :  { %1169 = vmatpush3.msra.mxu0 %v80_v13 }
 0xdc4   :  { %1170 = vmatprep.subr.mxu0 %v1378_v0 }
 0xdc5   :  { %1171 = vmatpush3.msra.mxu0 %v79_v14 }
 0xdc6   :  { %1172 = vmatprep.subr.mxu0 %v1378_v0 }
 0xdc7   :  { %1173 = vmatpush3.msra.mxu0 %v78_v63 }
 0xe22   :  { %v890_v39 = vpop.permute.xlu0 %889 }
 0xe80   :  { %v870_v26 = vpop.f32.mrf.mxu0 }
 0xe81   :  { %v871_v32 = vadd.f32 %v870_v26, %v799_v31 }
 0xe82   :  { %v872_v28 = vpop.f32.mrf.mxu0 }
 0xe83   :  { %v873_v29 = vadd.f32 %v872_v28, %v800_v27  ;;  %v1154_v33 = vmul.f32 -1.442695, %v871_v32 }
 0xe85   :  { %1261 = vtanh.f32 %v873_v29  ;;  %v1155_v44 = vmul.f32 -1.442695, %v873_v29 }
 0xe86   :  { %1263 = vpow2.f32 %v1154_v33 }
 0xe92   :  { %v1262_v30 = vpop.eup %1261 }
 0xe93   :  { %894 = vrot.lane.b32.xlu1 %v1262_v30, %s1379_s0  ;;  %v1264_v34 = vpop.eup %1263 }
 0xe94   :  { %v881_v35 = vadd.f32 1.0, %v1264_v34 }
 0xe96   :  { %1265 = vrcp.f32 %v881_v35 }
 0xea3   :  { %v1266_v36 = vpop.eup %1265 }
 0xea4   :  { %v892_v40 = vmul.f32 %v1266_v36, %v890_v39 }
 0xf05   :  { %v895_v37 = vpop.permute.xlu1 %894 }
 0xf06   :  { %v897_v38 = vmul.f32 %v1266_v36, %v895_v37 }
 0xf08   :  { %899 = vrot.lane.b32.xlu1 %v897_v38, %s1379_s0 }
 0xf7a   :  { %v900_v41 = vpop.permute.xlu1 %899 }
 0xf7b   :  { %v902_v42 = vadd.f32 %v900_v41, %v892_v40 }
 0xf7d   :  { %1267 = vtanh.f32 %v902_v42  ;;  %913 = vrot.lane.b32.xlu1 %v902_v42, %s1379_s0 }
 0xf7e   :  { %1269 = vpow2.f32 %v1155_v44 }
 0xf8a   :  { %v1268_v43 = vpop.eup %1267 }
 0xf8b   :  { %905 = vrot.lane.b32.xlu0 %v1268_v43, %s1379_s0  ;;  %v1270_v45 = vpop.eup %1269 }
 0xf8c   :  { %v882_v47 = vadd.f32 1.0, %v1270_v45 }
 0xf8e   :  { %1271 = vrcp.f32 %v882_v47 }
 0xf9b   :  { %v1272_v50 = vpop.eup %1271 }
 0xfef   :  { %v914_v48 = vpop.permute.xlu1 %913 }
 0xff0   :  { %v916_v49 = vsel %vm911_vm7, %v914_v48, %v796_v21 }
 0xff1   :  { %1009 = vrot.lane.b32.xlu1 %v916_v49, %s1379_s0 }
 0xffd   :  { %v906_v51 = vpop.permute.xlu0 %905 }
 0xffe   :  { %v908_v52 = vmul.f32 %v1272_v50, %v906_v51 }
0x1000   :  { %v917_v53 = vsel %vm911_vm7, %v908_v52, %v797_v25 }
0x1001   :  { %1156 = vmatmul.mubr.msk.f32.vlgmr.msra.gmra.mxu1 %vm85_vm1, %v917_v53 }
0x1063   :  { %v1010_v8 = vpop.permute.xlu1 %1009 }
0x10c1   :  { %v990_v54 = vpop.f32.mrf.mxu1 }
0x10c2   :  { %v991_v60 = vadd.f32 %v990_v54, %v919_v59 }
0x10c3   :  { %v992_v56 = vpop.f32.mrf.mxu1 }
0x10c4   :  { %v993_v57 = vadd.f32 %v992_v56, %v920_v55  ;;  %v1157_v2 = vmul.f32 -1.442695, %v991_v60 }
0x10c6   :  { %1273 = vtanh.f32 %v993_v57  ;;  %v1158_v16 = vmul.f32 -1.442695, %v993_v57 }
0x10c7   :  { %1275 = vpow2.f32 %v1157_v2 }
0x10d3   :  { %v1274_v58 = vpop.eup %1273 }
0x10d4   :  { %1014 = vrot.lane.b32.xlu0 %v1274_v58, %s1379_s0  ;;  %v1276_v3 = vpop.eup %1275 }
0x10d5   :  { %v1001_v4 = vadd.f32 1.0, %v1276_v3 }
0x10d7   :  { %1277 = vrcp.f32 %v1001_v4 }
0x10e4   :  { %v1278_v5 = vpop.eup %1277 }
0x10e5   :  { %v1012_v9 = vmul.f32 %v1278_v5, %v1010_v8 }
0x1146   :  { %v1015_v6 = vpop.permute.xlu0 %1014 }
0x1147   :  { %v1017_v7 = vmul.f32 %v1278_v5, %v1015_v6 }
0x1149   :  { %1019 = vrot.lane.b32.xlu0 %v1017_v7, %s1379_s0 }
0x11bb   :  { %v1020_v10 = vpop.permute.xlu0 %1019 }
0x11bc   :  { %v1022_v11 = vadd.f32 %v1020_v10, %v1012_v9 }
0x11be   :  { %1279 = vtanh.f32 %v1022_v11 }
0x11bf   :  { %1281 = vpow2.f32 %v1158_v16 }
0x11cb   :  { %v1280_v15 = vpop.eup %1279 }
0x11cc   :  { %1025 = vrot.lane.b32.xlu1 %v1280_v15, %s1379_s0  ;;  %v1282_v61 = vpop.eup %1281 }
0x11cd   :  { %v1002_v62 = vadd.f32 1.0, %v1282_v61 }
0x11cf   :  { %1283 = vrcp.f32 %v1002_v62 }
0x11dc   :  { %v1284_v18 = vpop.eup %1283 }
0x123e   :  { %v1026_v1 = vpop.permute.xlu1 %1025 }
0x123f   :  { %v1028_v19 = vmul.f32 %v1284_v18, %v1026_v1 }
0x1241   :  { %v1032_v20 = vsel %vm1031_vm9, %v1028_v19, %v917_v53 }
0x1242   :  { %1034 = vrot.lane.b32.xlu0 %v1032_v20, %s1381_s18 }
0x12b4   :  { %v1035_v21 = vpop.permute.xlu0 %1034 }
0x12b5   :  { %v1037_v22 = vadd.f32 %v1035_v21, %v1032_v20 }
0x12b7   :  { %1175 = vmatmul.mubr.msk.f32.vlgmr.msra.gmra.mxu0 %vm1044_vm10, %v1037_v22 }
0x1377   :  { %v1114_v24 = vpop.f32.mrf.mxu0 }
0x1378   :  { %v1115_v0 = vadd.f32 %v1159_v23, %v1114_v24 }
0x1379   :  { %v1176_v25 = vpop.f32.mrf.mxu0 }
0x137a   :  { %1119 = vst.msk [vmem:[#allocation8] sm:$0xff] %vm1118_vm11, %v1115_v0 }
0x137b   :  { %1356 = shalt.err (!%p1353_p5)
}
0x137c   :  { %1129 = dma.vmem_to_hbm [thread:$0]  %s1127_s21, 128, %s1664_s5, [#allocation4]  }
0x137d   :  { %1369 = dma.done.wait [#allocation4], 128  }
0x137e   :  { %1370 = vsyncadd [#allocation4], 4294967168 }
0x137f   :  { %1133 = vsyncpa [#allocation3], 1 }
0x1380   :  { %1134 = vsyncpa [#allocation6], 1 }
0x1381   :  { %1135 = vsyncpa [#allocation4], 1 }

</bundles_post_ra>
